<compile_context>
chip_gen: v7x
topology: tpu7x:2x2x1
jax: 0.10.0
libtpu: 0.0.40
codegen_flags: <defaults>
</compile_context>

<pallas_src>
import math

import jax
import jax.numpy as jnp
from jax.experimental import pallas as pl
from jax.experimental.pallas import tpu as pltpu

_LANE = 128
_SMALL_BYPASS_BYTES = 256 * 1024            # below this, plain XLA fusion wins
_SINGLE_BLOCK_MAX_BYTES = 2 * 1024 * 1024   # per-array cap for one-block kernels


# ----------------------------------------------------------------------------
# Kernels
# ----------------------------------------------------------------------------
def _mul_sq_kernel(l_ref, r_ref, o_ref):
    """out = (l * r)^2; r may be a smaller block that broadcasts against l."""
    l = l_ref[...].astype(o_ref.dtype)
    r = r_ref[...].astype(o_ref.dtype)     # in-kernel cast (VPU is free here)
    other = l * r                          # in-kernel (sublane/scalar) broadcast
    o_ref[...] = other * other


def _mul_sq_scalar_kernel(r_ref, l_ref, o_ref):
    """r_ref is a (1,) scalar in SMEM (the torch `.item()` path)."""
    r = r_ref[0].astype(o_ref.dtype)
    other = l_ref[...].astype(o_ref.dtype) * r
    o_ref[...] = other * other


# ----------------------------------------------------------------------------
# Hardware-dependent sizing
# ----------------------------------------------------------------------------
_HW_PARAMS = None


def _hw_params():
    """Return (vmem_limit_bytes, per-stream tile bytes) for this chip."""
    global _HW_PARAMS
    if _HW_PARAMS is None:
        try:
            cap = int(pltpu.get_tpu_info().vmem_capacity_bytes)
        except Exception:                       # be conservative if query fails
            cap = 64 << 20
        vmem_limit = max(16 << 20, min(48 << 20, cap - (16 << 20)))
        # Worst case pipeline footprint is ~8x the per-stream tile (scalar path:
        # 2 streams x 2 buffers x 2x tile), so keep tile <= vmem_limit / 10.
        tile_mib = max(1, min(4, vmem_limit // 10 // (1 << 20)))
        _HW_PARAMS = (vmem_limit, tile_mib << 20)
    return _HW_PARAMS


def _pick_tile_rows(rows, cols, itemsize, tile_bytes):
    tr = max(8, (tile_bytes // (cols * itemsize)) // 8 * 8)
    return rows if rows <= tr else tr


def _compiler_params(vmem_limit):
    return pltpu.CompilerParams(dimension_semantics=("parallel",),
                                vmem_limit_bytes=vmem_limit)


# ----------------------------------------------------------------------------
# pallas_call wrappers
# ----------------------------------------------------------------------------
def _tiled_same_2d(left2d, right2d, out_dtype):
    vmem_limit, tile_bytes = _hw_params()
    rows, cols = left2d.shape
    itemsize = max(left2d.dtype.itemsize, right2d.dtype.itemsize,
                   jnp.dtype(out_dtype).itemsize)
    tr = _pick_tile_rows(rows, cols, itemsize, tile_bytes)
    return pl.pallas_call(
        _mul_sq_kernel,
        out_shape=jax.ShapeDtypeStruct((rows, cols), out_dtype),
        grid_spec=pltpu.PrefetchScalarGridSpec(
            num_scalar_prefetch=0,
            grid=(pl.cdiv(rows, tr),),
            in_specs=[pl.BlockSpec((tr, cols), lambda i: (i, 0)),
                      pl.BlockSpec((tr, cols), lambda i: (i, 0))],
            out_specs=pl.BlockSpec((tr, cols), lambda i: (i, 0)),
        ),
        compiler_params=_compiler_params(vmem_limit),
    )(left2d, right2d)


def _tiled_rowbcast_2d(left2d, right2d, out_dtype):
    """left2d: (outer, inner); right2d: (1, inner) — broadcast done in VMEM."""
    vmem_limit, tile_bytes = _hw_params()
    rows, inner = left2d.shape
    itemsize = max(left2d.dtype.itemsize, jnp.dtype(out_dtype).itemsize)
    tr = _pick_tile_rows(rows, inner, itemsize, tile_bytes)
    return pl.pallas_call(
        _mul_sq_kernel,
        out_shape=jax.ShapeDtypeStruct((rows, inner), out_dtype),
        grid_spec=pltpu.PrefetchScalarGridSpec(
            num_scalar_prefetch=0,
            grid=(pl.cdiv(rows, tr),),
            in_specs=[pl.BlockSpec((tr, inner), lambda i: (i, 0)),
                      # same (0, 0) block every step -> DMA'd to VMEM once,
                      # never materialized full-size in HBM.
                      pl.BlockSpec((1, inner), lambda i: (0, 0))],
            out_specs=pl.BlockSpec((tr, inner), lambda i: (i, 0)),
        ),
        compiler_params=_compiler_params(vmem_limit),
    )(left2d, right2d)


def _tiled_scalar_2d(left2d, right_smem, out_dtype):
    vmem_limit, tile_bytes = _hw_params()
    rows, cols = left2d.shape
    itemsize = max(left2d.dtype.itemsize, jnp.dtype(out_dtype).itemsize)
    # Only two tensor streams (left in / out out) -> afford 2x larger tiles.
    tr = _pick_tile_rows(rows, cols, itemsize, 2 * tile_bytes)
    return pl.pallas_call(
        _mul_sq_scalar_kernel,
        out_shape=jax.ShapeDtypeStruct((rows, cols), out_dtype),
        grid_spec=pltpu.PrefetchScalarGridSpec(
            num_scalar_prefetch=0,
            grid=(pl.cdiv(rows, tr),),
            in_specs=[pl.BlockSpec(memory_space=pltpu.MemorySpace.SMEM),
                      pl.BlockSpec((tr, cols), lambda i: (i, 0))],
            out_specs=pl.BlockSpec((tr, cols), lambda i: (i, 0)),
        ),
        compiler_params=_compiler_params(vmem_limit),
    )(right_smem, left2d)


def _single_block(left, right, out_dtype):
    """Whole-array single-block kernel (small / ragged shapes; no padding)."""
    vmem_limit, _ = _hw_params()
    return pl.pallas_call(
        _mul_sq_kernel,
        out_shape=jax.ShapeDtypeStruct(left.shape, out_dtype),
        compiler_params=pltpu.CompilerParams(vmem_limit_bytes=vmem_limit),
    )(left, right)


# ----------------------------------------------------------------------------
# dtype / broadcast helpers
# ----------------------------------------------------------------------------
def _result_dtype(left_dtype, right_dtype, scalar_item):
    """Approximate torch type promotion (weak scalar for the .item() branch)."""
    if not scalar_item:
        return jnp.dtype(jnp.result_type(left_dtype, right_dtype))
    if jnp.issubdtype(right_dtype, jnp.floating):
        if jnp.issubdtype(left_dtype, jnp.floating):
            return jnp.dtype(left_dtype)
        return jnp.dtype(jnp.float32)        # int/bool tensor * python float
    return jnp.dtype(left_dtype)             # python int keeps the tensor dtype


def _scalar_operand(right):
    """Scalar for SMEM: float scalars as f32, integer/bool scalars as i32."""
    smem_dt = jnp.float32 if jnp.issubdtype(right.dtype, jnp.floating) else jnp.int32
    return jnp.reshape(right, (1,)).astype(smem_dt)


def _leading_broadcast_inner(l_shape, r_shape):
    """If `r` broadcasts only over leading dims of `l`, return the shared
    trailing ('inner') element count; otherwise None."""
    rp = (1,) * (len(l_shape) - len(r_shape)) + tuple(r_shape)
    for k in range(len(l_shape) + 1):
        if all(d == 1 for d in rp[:k]) and tuple(rp[k:]) == tuple(l_shape[k:]):
            return math.prod(l_shape[k:]) if k < len(l_shape) else 1
    return None


# ----------------------------------------------------------------------------
# Dispatchers
# ----------------------------------------------------------------------------
def _dispatch_scalar(left, right, out_dtype):
    n = left.size
    shape = left.shape
    if n % _LANE == 0:                                     # aligned fast path
        rows = n // _LANE
        out2d = _tiled_scalar_2d(left.reshape(rows, _LANE),
                                 _scalar_operand(right), out_dtype)
        return out2d.reshape(shape)
    max_item = max(left.dtype.itemsize, jnp.dtype(out_dtype).itemsize)
    if n * max_item <= _SINGLE_BLOCK_MAX_BYTES:            # ragged but small
        r_nd = jnp.reshape(right, (1,) * left.ndim)        # splat in-kernel
        return _single_block(left, r_nd, out_dtype)
    # Ragged *and* large (rare): pad to a lane multiple (one extra HBM pass).
    pad = (-n) % _LANE
    lf = jnp.pad(left.reshape(-1), (0, pad))
    rows = (n + pad) // _LANE
    out2d = _tiled_scalar_2d(lf.reshape(rows, _LANE),
                             _scalar_operand(right), out_dtype)
    return out2d.reshape(-1)[:n].reshape(shape)


def _dispatch_same_shape(left, right, out_dtype):
    n = left.size
    shape = left.shape
    if n % _LANE == 0:                                     # aligned fast path
        rows = n // _LANE
        out2d = _tiled_same_2d(left.reshape(rows, _LANE),
                               right.reshape(rows, _LANE), out_dtype)
        return out2d.reshape(shape)
    max_item = max(left.dtype.itemsize, right.dtype.itemsize,
                   jnp.dtype(out_dtype).itemsize)
    if n * max_item <= _SINGLE_BLOCK_MAX_BYTES:            # ragged but small
        return _single_block(left, right, out_dtype)
    # Ragged *and* large (rare): pad to a lane multiple (extra HBM passes).
    pad = (-n) % _LANE
    lf = jnp.pad(left.reshape(-1), (0, pad))
    rf = jnp.pad(right.reshape(-1), (0, pad))
    rows = (n + pad) // _LANE
    out2d = _tiled_same_2d(lf.reshape(rows, _LANE), rf.reshape(rows, _LANE),
                           out_dtype)
    return out2d.reshape(-1)[:n].reshape(shape)


def _dispatch_broadcast(left, right, out_dtype):
    _, tile_bytes = _hw_params()
    max_item = max(left.dtype.itemsize, right.dtype.itemsize,
                   jnp.dtype(out_dtype).itemsize)
    inner = _leading_broadcast_inner(left.shape, right.shape)
    if (inner is not None and inner % _LANE == 0
            and 8 * inner * max_item <= 2 * tile_bytes):
        outer = left.size // inner
        out2d = _tiled_rowbcast_2d(left.reshape(outer, inner),
                                   right.reshape(1, inner), out_dtype)
        return out2d.reshape(left.shape)
    # Irregular broadcast pattern: materialize `right` (negligible when small).
    # TODO(synk): cover more broadcast patterns via index_map / in-kernel
    # broadcasting so large irregular broadcasts avoid this extra HBM pass.
    return _dispatch_same_shape(left, jnp.broadcast_to(right, left.shape),
                                out_dtype)


# ----------------------------------------------------------------------------
# Public entry point (== SimpleMulModule.forward)
# ----------------------------------------------------------------------------
def simple_mul_module(left, right, *, small_bypass=True):
    """JAX/Pallas equivalent of SimpleMulModule.forward: (left * right) ** 2."""
    left = jnp.asarray(left)
    right = jnp.asarray(right)
    scalar_item = (right.ndim == 0)               # torch's `.item()` branch
    out_dtype = _result_dtype(left.dtype, right.dtype, scalar_item)

    if left.ndim == 0 and right.ndim == 0:        # degenerate 0-d case
        other = left.astype(out_dtype) * right.astype(out_dtype)
        return other * other

    if not scalar_item:
        bshape = jnp.broadcast_shapes(left.shape, right.shape)
        if left.shape != bshape:
            if right.shape == bshape:
                left, right = right, left         # (l*r)^2 is symmetric
            else:
                left = jnp.broadcast_to(left, bshape)   # rare two-sided bcast

    out_bytes = math.prod(left.shape) * jnp.dtype(out_dtype).itemsize
    if small_bypass and out_bytes <= _SMALL_BYPASS_BYTES:
        # Single-tile problem: plain XLA fusion beats pallas_call setup cost.
        other = left.astype(out_dtype) * right.astype(out_dtype)
        return other * other

    if scalar_item or right.size == 1:
        return _dispatch_scalar(left, jnp.reshape(right, ()), out_dtype)
    if right.shape == left.shape:
        return _dispatch_same_shape(left, right, out_dtype)
    return _dispatch_broadcast(left, right, out_dtype)


# ----------------------------------------------------------------------------
# Self-test
# ----------------------------------------------------------------------------
if __name__ == "__main__":
    key = jax.random.PRNGKey(0)
    ks = jax.random.split(key, 8)

    def check(name, out, ref, atol=1e-6, rtol=1e-6):
        out = jax.block_until_ready(out)
        assert out.shape == ref.shape, f"{name}: shape {out.shape} vs {ref.shape}"
        assert out.dtype == ref.dtype, f"{name}: dtype {out.dtype} vs {ref.dtype}"
        assert jnp.allclose(out, ref, atol=atol, rtol=rtol), f"{name}: mismatch"

    # 1) tensor * tensor, same shape (aligned lane-dense tiled path)
    left = jax.random.normal(ks[0], (2, 4, 16, 16), dtype=jnp.float32)
    right = jax.random.normal(ks[1], (2, 4, 16, 16), dtype=jnp.float32)
    check("same-shape", simple_mul_module(left, right, small_bypass=False),
          (left * right) ** 2)

    # 2) scalar right (torch right.size() == Size([]) -> .item() path, SMEM)
    r_scalar = jax.random.normal(ks[2], (), dtype=jnp.float32)
    check("scalar", simple_mul_module(left, r_scalar, small_bypass=False),
          (left * r_scalar) ** 2)

    # 3) right broadcasting over leading dims (kept un-materialized in HBM)
    left_b = jax.random.normal(ks[3], (2, 4, 16, 128), dtype=jnp.float32)
    right_b = jax.random.normal(ks[4], (16, 128), dtype=jnp.float32)
    check("row-broadcast",
          simple_mul_module(left_b, right_b, small_bypass=False),
          (left_b * right_b) ** 2)

    # 4) irregular broadcast (per-channel scale) -> materialize + tiled path
    right_c = jax.random.normal(ks[5], (4, 1, 1), dtype=jnp.float32)
    check("channel-broadcast",
          simple_mul_module(left, right_c, small_bypass=False),
          (left * right_c) ** 2)

    # 5) ragged (non lane-multiple) shape with a scalar right (no pad copies)
    left_r = jax.random.normal(ks[6], (3, 5, 7), dtype=jnp.float32)
    check("ragged", simple_mul_module(left_r, r_scalar, small_bypass=False),
          (left_r * r_scalar) ** 2)

    # 6) mixed dtypes: bf16 right is cast to f32 on the VPU inside the kernel
    right_h = jax.random.normal(ks[7], (2, 4, 16, 16), dtype=jnp.bfloat16)
    check("mixed-dtype", simple_mul_module(left, right_h, small_bypass=False),
          (left * right_h.astype(jnp.float32)) ** 2)

    # 7) small-size bypass path (plain XLA fusion)
    check("bypass", simple_mul_module(left, right), (left * right) ** 2)

    print("KERNEL_OK")
</pallas_src>

<mosaic_0001>
module attributes {stable_mosaic.version = 11 : i64} {
  func.func @_mul_sq_kernel(%arg0: i32, %arg1: memref<16x128xf32, #tpu.memory_space<vmem>>, %arg2: memref<16x128xf32, #tpu.memory_space<vmem>>, %arg3: memref<16x128xf32, #tpu.memory_space<vmem>>) attributes {dimension_semantics = [#tpu.dimension_semantics<parallel>], iteration_bounds = array<i64: 1>, scalar_prefetch = 0 : i64, scratch_operands = 0 : i64, tpu.core_type = #tpu.core_type<tc>, window_params = [{transform_indices = @transform_0, window_bounds = array<i64: 16, 128>}, {transform_indices = @transform_1, window_bounds = array<i64: 16, 128>}, {transform_indices = @transform_2, window_bounds = array<i64: 16, 128>}]} {
    %c0 = arith.constant 0 : index
    %c0_0 = arith.constant 0 : index
    %0 = vector.load %arg1[%c0, %c0_0] : memref<16x128xf32, #tpu.memory_space<vmem>>, vector<16x128xf32>
    %c0_1 = arith.constant 0 : index
    %c0_2 = arith.constant 0 : index
    %1 = vector.load %arg2[%c0_1, %c0_2] : memref<16x128xf32, #tpu.memory_space<vmem>>, vector<16x128xf32>
    %2 = arith.mulf %0, %1 : vector<16x128xf32>
    %3 = arith.mulf %2, %2 : vector<16x128xf32>
    %c0_3 = arith.constant 0 : index
    %c0_4 = arith.constant 0 : index
    %4 = vector.load %arg3[%c0_3, %c0_4] : memref<16x128xf32, #tpu.memory_space<vmem>>, vector<16x128xf32>
    tpu.vector_store %arg3[%c0_3, %c0_4], %3 {strides = array<i32>} : memref<16x128xf32, #tpu.memory_space<vmem>>, vector<16x128xf32>,
    return
  }
  func.func @transform_0(%arg0: i32) -> (i32, i32) {
    %c0_i32 = arith.constant 0 : i32
    %c0_i32_0 = arith.constant 0 : i32
    return %arg0, %c0_i32 : i32, i32
  }
  func.func @transform_1(%arg0: i32) -> (i32, i32) {
    %c0_i32 = arith.constant 0 : i32
    %c0_i32_0 = arith.constant 0 : i32
    return %arg0, %c0_i32 : i32, i32
  }
  func.func @transform_2(%arg0: i32) -> (i32, i32) {
    %c0_i32 = arith.constant 0 : i32
    %c0_i32_0 = arith.constant 0 : i32
    return %arg0, %c0_i32 : i32, i32
  }
}

</mosaic_0001>

<bundles_post_ra>
// kernel: tpu_custom_call.1
= control target key start
LH: loop header
LB: loop body
LE: loop exit
PB: predicated region body
PF: predicated region fallthrough
CT: control target
= control target key end

     0   :  { %7 = vsyncpa [#allocation3], 0  ;;  %s210_s0 = inlined_call_operand.hbm [shape: f32[16,128], index: 0, kind: input, shape index: {}]   ;;  %s211_s1 = inlined_call_operand.hbm [shape: f32[16,128], index: 1, kind: input, shape index: {}]   ;;  %s212_s2 = inlined_call_operand.hbm [shape: f32[16,128], index: 2, kind: output, shape index: {}]  }
   0x1   :  { %8 = vsyncpa [#allocation6], 0 }
   0x2   :  { %9 = vsyncpa [#allocation4], 0  ;;  %s145_s9 = smov [#allocation2]   ;;  %s73_s13 = scalar_lea.hbm %s210_s0, 256 }
   0x3   :  { %s15_s10 = sshll.u32 %s145_s9, 4  ;;  %p74_p0 = scmp.ne.s32.totalorder %s210_s0, %s73_s13  ;;  %s16_s10 = int_to_ptr.vmem [resolvable:$true] %s15_s10 }
   0x4   :  { %p77_p1 = scmp.lt.u32.totalorder %s73_s13, %s210_s0 }
   0x6   :  { %p79_p2 = pnand %p77_p1, %p74_p0 }
   0x8   :  { %82 = shalt.err (!%p79_p2)
}
   0x9   :  { %s83_s18 = scalar_lea.vmem %s16_s10, 256  ;;  %p88_p4 = scmp.lt.s32.totalorder %s16_s10, %s16_s10 }
   0xa   :  { %p84_p3 = scmp.ne.s32.totalorder %s16_s10, %s83_s18  ;;  %p89_p5 = scmp.lt.s32.totalorder %s83_s18, %s83_s18 }
   0xc   :  { %p90_p6 = por %p89_p5, %p88_p4 }
   0xe   :  { %p91_p7 = pnand %p90_p6, %p84_p3 }
  0x10   :  { %94 = shalt.err (!%p91_p7)
}
  0x11   :  { %s146_s19 = smov 128   ;;  %s147_s20 = smov 8  }
  0x12   :  { %21 = dma.hbm_to_vmem [thread:$0]  %s210_s0, 256, %s16_s10, [#allocation3], %s146_s19, %s146_s19, %s147_s20  }
  0x13   :  { %s148_s23 = smov [#allocation5]   ;;  %s95_s27 = scalar_lea.hbm %s211_s1, 256 }
  0x14   :  { %s27_s24 = sshll.u32 %s148_s23, 4  ;;  %p96_p8 = scmp.ne.s32.totalorder %s211_s1, %s95_s27  ;;  %s28_s24 = int_to_ptr.vmem [resolvable:$true] %s27_s24 }
  0x15   :  { %p99_p9 = scmp.lt.u32.totalorder %s95_s27, %s211_s1 }
  0x17   :  { %p101_p10 = pnand %p99_p9, %p96_p8 }
  0x19   :  { %104 = shalt.err (!%p101_p10)
}
  0x1a   :  { %s105_s4 = scalar_lea.vmem %s28_s24, 256  ;;  %p110_p12 = scmp.lt.s32.totalorder %s28_s24, %s28_s24 }
  0x1b   :  { %p106_p11 = scmp.ne.s32.totalorder %s28_s24, %s105_s4  ;;  %p111_p13 = scmp.lt.s32.totalorder %s105_s4, %s105_s4 }
  0x1d   :  { %p112_p0 = por %p111_p13, %p110_p12 }
  0x1f   :  { %p113_p1 = pnand %p112_p0, %p106_p11 }
  0x21   :  { %116 = shalt.err (!%p113_p1)
}
  0x22   :  { %33 = dma.hbm_to_vmem [thread:$0]  %s211_s1, 256, %s28_s24, [#allocation6], %s146_s19, %s146_s19, %s147_s20  }
  0x23   :  { %139 = dma.done.wait [#allocation3], 256  }
  0x24   :  { %140 = vsyncadd [#allocation3], 4294967040 }
  0x25   :  { %141 = dma.done.wait [#allocation6], 256  }
  0x26   :  { %142 = vsyncadd [#allocation6], 4294967040  ;;  %v40_v0 = vld [vmem:[#allocation2] sm:$0xff]  ;;  %v42_v1 = vld [vmem:[#allocation5] sm:$0xff]  ;;  %s149_s6 = smov [#allocation7]  }
  0x27   :  { %v41_v2 = vld [vmem:[#allocation2 + $0x8] sm:$0xff]  ;;  %v44_v3 = vmul.f32 %v42_v1, %v40_v0  ;;  %v43_v4 = vld [vmem:[#allocation5 + $0x8] sm:$0xff]  ;;  %s55_s7 = sshll.u32 %s149_s6, 4  ;;  %s56_s7 = int_to_ptr.vmem [resolvable:$true] %s55_s7 }
  0x28   :  { %v45_v5 = vmul.f32 %v43_v4, %v41_v2  ;;  %s117_s8 = scalar_lea.vmem %s56_s7, 256  ;;  %p122_p3 = scmp.lt.s32.totalorder %s56_s7, %s56_s7 }
  0x29   :  { %v46_v6 = vmul.f32 %v44_v3, %v44_v3  ;;  %p118_p2 = scmp.ne.s32.totalorder %s56_s7, %s117_s8  ;;  %p123_p4 = scmp.lt.s32.totalorder %s117_s8, %s117_s8 }
  0x2a   :  { %v47_v7 = vmul.f32 %v45_v5, %v45_v5 }
  0x2b   :  { %48 = vst [vmem:[#allocation7] sm:$0xff] %v46_v6  ;;  %p124_p5 = por %p123_p4, %p122_p3 }
  0x2c   :  { %49 = vst [vmem:[#allocation7 + $0x8] sm:$0xff] %v47_v7 }
  0x2d   :  { %p125_p6 = pnand %p124_p5, %p118_p2 }
  0x2f   :  { %128 = shalt.err (!%p125_p6)
}
  0x30   :  { %s129_s10 = scalar_lea.hbm %s212_s2, 256 }
  0x31   :  { %p130_p7 = scmp.ne.s32.totalorder %s212_s2, %s129_s10  ;;  %p133_p8 = scmp.lt.u32.totalorder %s129_s10, %s212_s2 }
  0x33   :  { %p135_p9 = pnand %p133_p8, %p130_p7 }
  0x35   :  { %138 = shalt.err (!%p135_p9)
}
  0x36   :  { %61 = dma.vmem_to_hbm [thread:$0]  %s56_s7, 256, %s212_s2, [#allocation4], %s146_s19, %s146_s19, %s147_s20  }
  0x37   :  { %143 = dma.done.wait [#allocation4], 256  }
  0x38   :  { %144 = vsyncadd [#allocation4], 4294967040 }
  0x39   :  { %65 = vsyncpa [#allocation3], 1 }
  0x3a   :  { %66 = vsyncpa [#allocation6], 1 }
  0x3b   :  { %67 = vsyncpa [#allocation4], 1 }

</bundles_post_ra>
